<compile_context>
chip_gen: v7x
topology: tpu7x:2x2x1
jax: 0.10.0
libtpu: 0.0.40
codegen_flags: <defaults>
</compile_context>

<pallas_src>
import functools

import jax
import jax.numpy as jnp
from jax.experimental import pallas as pl
from jax.experimental.pallas import tpu as pltpu


def _layernorm_kernel(x_ref, gamma_ref, beta_ref, o_ref, *, eps, inv_d, use_mxu):
    """Normalize each row of the (tile_rows, D) block over the lane (D) axis."""
    x = x_ref[...].astype(jnp.float32)

    if use_mxu:
        # Lane reductions on the otherwise-idle MXU (separate VLIW slot):
        # frees the VPU reduce-add chains on VALU-bound generations (v7x).
        ones = jnp.ones((x.shape[-1], 1), dtype=jnp.float32)
        s = jnp.dot(x, ones, preferred_element_type=jnp.float32)         # (T, 1)
    else:
        s = jnp.sum(x, axis=-1, keepdims=True)
    mean = s * inv_d

    # Centered variance (robust: no E[x^2]-mean^2 cancellation); xc is reused
    # for the output so the extra work is a single multiply per element.
    xc = x - mean
    if use_mxu:
        s2 = jnp.dot(xc * xc, ones, preferred_element_type=jnp.float32)  # (T, 1)
    else:
        s2 = jnp.sum(xc * xc, axis=-1, keepdims=True)
    var = s2 * inv_d
    inv = jax.lax.rsqrt(var + eps)

    # gamma/beta arrive pre-upcast to f32 (1, D); implicit broadcast over rows.
    o_ref[...] = (xc * inv * gamma_ref[...] + beta_ref[...]).astype(o_ref.dtype)


def _round_up(n, m):
    return ((n + m - 1) // m) * m


def _vmem_capacity_bytes():
    """Generation-aware VMEM capacity; conservative fallback = 64 MiB (v7x)."""
    try:
        info = pltpu.get_tpu_info()
        cap = getattr(info, "vmem_capacity_bytes", None)
        if cap:
            return int(cap)
    except Exception:
        pass
    return 64 << 20


def _budgets():
    """(streaming VMEM budget, vmem_limit_bytes) per generation."""
    cap = _vmem_capacity_bytes()
    if cap >= (96 << 20):      # v5e / v6e: 128 MiB physical VMEM
        return 64 << 20, 96 << 20
    # v7x (or unknown): 64 MiB physical VMEM -> leave headroom
    return 20 << 20, 40 << 20


def _choose_tile_rows(rows, d_model, itemsize, stream_budget):
    """Row tile: big (HBM roofline), VMEM-safe, sublane-aligned, >=2 blocks."""
    # Sublane packing: 8 rows/vreg for 32-bit, 16 for bf16/f16, 32 for 8-bit.
    packing = 8 * max(1, 4 // max(itemsize, 1))
    row_bytes = d_model * max(itemsize, 1)

    # Target ~8 MiB of INPUT per grid step (long, lane-dense DMAs).
    target_rows = max(packing, (8 << 20) // row_bytes)

    # VMEM cap per step: double-buffered input + output tiles in storage
    # dtype (4*itemsize B/elem) plus in-kernel f32 temporaries (~12 B/elem:
    # upcast x, xc, xc*xc / pre-cast output).
    per_row_bytes = (4 * itemsize + 12) * d_model
    vmem_rows = max(packing, stream_budget // per_row_bytes)

    tile = min(target_rows, vmem_rows)
    tile = max(packing, (tile // packing) * packing)

    if tile >= rows:
        if rows > packing:
            # Keep at least 2 blocks: shards work across v7x's 2 TensorCores
            # and preserves DMA/compute pipelining.
            tile = min(tile, _round_up(pl.cdiv(rows, 2), packing))
        else:
            tile = rows  # tiny input: single full block (always legal)
    return int(tile)


def layer_norm(x, gamma, beta, *, eps=1e-6):
    """x: (..., d_model); gamma, beta: (d_model,). Matches torch LayerNorm."""
    orig_shape = x.shape
    d_model = orig_shape[-1]
    x2 = x.reshape(-1, d_model)
    rows = x2.shape[0]
    itemsize = jnp.dtype(x2.dtype).itemsize

    stream_budget, vmem_limit = _budgets()
    tile = _choose_tile_rows(rows, d_model, itemsize, stream_budget)
    n_blocks = pl.cdiv(rows, tile)  # ragged last block handled by Pallas

    # Hoist the gamma/beta upcast out of the kernel (block-invariant operands).
    gamma2 = gamma.astype(jnp.float32).reshape(1, d_model)
    beta2 = beta.astype(jnp.float32).reshape(1, d_model)

    # MXU-assisted lane reductions for production widths (multiples of 128);
    # tiny widths use the plain VPU reduction path.
    use_mxu = (d_model % 128 == 0)

    kernel = functools.partial(
        _layernorm_kernel,
        eps=float(eps),
        inv_d=1.0 / float(d_model),
        use_mxu=use_mxu,
    )

    out = pl.pallas_call(
        kernel,
        out_shape=jax.ShapeDtypeStruct((rows, d_model), x.dtype),
        grid_spec=pltpu.PrefetchScalarGridSpec(
            num_scalar_prefetch=0,
            grid=(n_blocks,),
            in_specs=[
                pl.BlockSpec((tile, d_model), lambda i: (i, 0)),
                pl.BlockSpec((1, d_model), lambda i: (0, 0)),
                pl.BlockSpec((1, d_model), lambda i: (0, 0)),
            ],
            out_specs=pl.BlockSpec((tile, d_model), lambda i: (i, 0)),
        ),
        compiler_params=pltpu.CompilerParams(
            # Row blocks are independent -> shards across TensorCores on v7x.
            dimension_semantics=("parallel",),
            vmem_limit_bytes=int(vmem_limit),
        ),
    )(x2, gamma2, beta2)

    return out.reshape(orig_shape)


def _reference(x, gamma, beta, eps):
    mean = jnp.mean(x, axis=-1, keepdims=True)
    var = jnp.mean((x - mean) ** 2, axis=-1, keepdims=True)
    return (x - mean) / jnp.sqrt(var + eps) * gamma + beta


if __name__ == "__main__":
    key = jax.random.PRNGKey(0)

    # Case 1: the module's small smoke shape (d_model=32 -> VPU reduction path).
    batch, seq, d_model = 2, 8, 32
    x = jax.random.normal(key, (batch, seq, d_model), dtype=jnp.float32)
    gamma = jnp.ones((d_model,), dtype=jnp.float32)   # nn.LayerNorm default init
    beta = jnp.zeros((d_model,), dtype=jnp.float32)
    y = layer_norm(x, gamma, beta, eps=1e-6)          # module spec: eps=1e-06
    jax.block_until_ready(y)
    assert jnp.allclose(y, _reference(x, gamma, beta, 1e-6),
                        atol=1e-5, rtol=1e-5), "mismatch vs reference (d=32)"

    # Case 2: lane-dense width (d_model=128 -> MXU-assisted reduction path).
    d_model2 = 128
    x2 = jax.random.normal(jax.random.PRNGKey(1), (batch, seq, d_model2),
                           dtype=jnp.float32)
    gamma2 = jnp.ones((d_model2,), dtype=jnp.float32)
    beta2 = jnp.zeros((d_model2,), dtype=jnp.float32)
    y2 = layer_norm(x2, gamma2, beta2, eps=1e-6)
    jax.block_until_ready(y2)
    assert jnp.allclose(y2, _reference(x2, gamma2, beta2, 1e-6),
                        atol=1e-5, rtol=1e-5), "mismatch vs reference (d=128)"

    print("KERNEL_OK")
</pallas_src>

<mosaic_0001>
module attributes {stable_mosaic.version = 11 : i64} {
  func.func @_layernorm_kernel(%arg0: i32, %arg1: memref<8x32xf32, #tpu.memory_space<vmem>>, %arg2: memref<1x32xf32, #tpu.memory_space<vmem>>, %arg3: memref<1x32xf32, #tpu.memory_space<vmem>>, %arg4: memref<8x32xf32, #tpu.memory_space<vmem>>) attributes {dimension_semantics = [#tpu.dimension_semantics<parallel>], iteration_bounds = array<i64: 2>, scalar_prefetch = 0 : i64, scratch_operands = 0 : i64, tpu.core_type = #tpu.core_type<tc>, window_params = [{transform_indices = @transform_0, window_bounds = array<i64: 8, 32>}, {pipeline_mode = #tpu.pipeline_mode<synchronous>, transform_indices = @transform_1, window_bounds = array<i64: 1, 32>}, {pipeline_mode = #tpu.pipeline_mode<synchronous>, transform_indices = @transform_2, window_bounds = array<i64: 1, 32>}, {transform_indices = @transform_3, window_bounds = array<i64: 8, 32>}]} {
    %c0 = arith.constant 0 : index
    %c0_0 = arith.constant 0 : index
    %0 = vector.load %arg1[%c0, %c0_0] : memref<8x32xf32, #tpu.memory_space<vmem>>, vector<8x32xf32>
    %cst = arith.constant dense<0.000000e+00> : vector<8xf32>
    %1 = vector.multi_reduction <add>, %0, %cst [1] : vector<8x32xf32> to vector<8xf32>
    %2 = vector.shape_cast %1 : vector<8xf32> to vector<8x1xf32>
    %cst_1 = arith.constant 3.125000e-02 : f32
    %3 = vector.broadcast %cst_1 : f32 to vector<8x1xf32>
    %4 = arith.mulf %2, %3 : vector<8x1xf32>
    %5 = vector.broadcast %4 : vector<8x1xf32> to vector<8x32xf32>
    %6 = arith.subf %0, %5 : vector<8x32xf32>
    %7 = arith.mulf %6, %6 : vector<8x32xf32>
    %cst_2 = arith.constant dense<0.000000e+00> : vector<8xf32>
    %8 = vector.multi_reduction <add>, %7, %cst_2 [1] : vector<8x32xf32> to vector<8xf32>
    %9 = vector.shape_cast %8 : vector<8xf32> to vector<8x1xf32>
    %cst_3 = arith.constant 3.125000e-02 : f32
    %10 = vector.broadcast %cst_3 : f32 to vector<8x1xf32>
    %11 = arith.mulf %9, %10 : vector<8x1xf32>
    %cst_4 = arith.constant 9.99999997E-7 : f32
    %12 = vector.broadcast %cst_4 : f32 to vector<8x1xf32>
    %13 = arith.addf %11, %12 : vector<8x1xf32>
    %14 = math.rsqrt %13 : vector<8x1xf32>
    %15 = vector.broadcast %14 : vector<8x1xf32> to vector<8x32xf32>
    %16 = arith.mulf %6, %15 : vector<8x32xf32>
    %c0_5 = arith.constant 0 : index
    %c0_6 = arith.constant 0 : index
    %17 = vector.load %arg2[%c0_5, %c0_6] : memref<1x32xf32, #tpu.memory_space<vmem>>, vector<1x32xf32>
    %18 = vector.broadcast %17 : vector<1x32xf32> to vector<8x32xf32>
    %19 = arith.mulf %16, %18 : vector<8x32xf32>
    %c0_7 = arith.constant 0 : index
    %c0_8 = arith.constant 0 : index
    %20 = vector.load %arg3[%c0_7, %c0_8] : memref<1x32xf32, #tpu.memory_space<vmem>>, vector<1x32xf32>
    %21 = vector.broadcast %20 : vector<1x32xf32> to vector<8x32xf32>
    %22 = arith.addf %19, %21 : vector<8x32xf32>
    %c0_9 = arith.constant 0 : index
    %c0_10 = arith.constant 0 : index
    %23 = vector.load %arg4[%c0_9, %c0_10] : memref<8x32xf32, #tpu.memory_space<vmem>>, vector<8x32xf32>
    tpu.vector_store %arg4[%c0_9, %c0_10], %22 {strides = array<i32>} : memref<8x32xf32, #tpu.memory_space<vmem>>, vector<8x32xf32>,
    return
  }
  func.func @transform_0(%arg0: i32) -> (i32, i32) {
    %c0_i32 = arith.constant 0 : i32
    %c0_i32_0 = arith.constant 0 : i32
    return %arg0, %c0_i32 : i32, i32
  }
  func.func @transform_1(%arg0: i32) -> (i32, i32) {
    %c0_i32 = arith.constant 0 : i32
    %c0_i32_0 = arith.constant 0 : i32
    %c0_i32_1 = arith.constant 0 : i32
    return %c0_i32, %c0_i32_0 : i32, i32
  }
  func.func @transform_2(%arg0: i32) -> (i32, i32) {
    %c0_i32 = arith.constant 0 : i32
    %c0_i32_0 = arith.constant 0 : i32
    %c0_i32_1 = arith.constant 0 : i32
    return %c0_i32, %c0_i32_0 : i32, i32
  }
  func.func @transform_3(%arg0: i32) -> (i32, i32) {
    %c0_i32 = arith.constant 0 : i32
    %c0_i32_0 = arith.constant 0 : i32
    return %arg0, %c0_i32 : i32, i32
  }
}

</mosaic_0001>

<bundles_post_ra>
// kernel: tpu_custom_call.1
= control target key start
LH: loop header
LB: loop body
LE: loop exit
PB: predicated region body
PF: predicated region fallthrough
CT: control target
= control target key end

     0   :  { %8 = vsyncpa [#allocation3], 0  ;;  %s654_s0 = inlined_call_operand.hbm [shape: f32[16,32], index: 0, kind: input, shape index: {}]   ;;  %s655_s1 = inlined_call_operand.vmem [shape: f32[1,32], index: 1, kind: input, shape index: {}]   ;;  %s656_s2 = inlined_call_operand.vmem [shape: f32[1,32], index: 2, kind: input, shape index: {}]   ;;  %s657_s3 = inlined_call_operand.hbm [shape: f32[16,32], index: 3, kind: output, shape index: {}]  }
   0x1   :  { %10 = vsyncpa [#allocation3 + $0x1], 0 }
   0x2   :  { %11 = vsyncpa [#allocation4], 0 }
   0x3   :  { %13 = vsyncpa [#allocation4 + $0x1], 0  ;;  %s484_s12 = smov 0   ;;  %s486_s13 = smov 0  }
   0x4   :  { %s488_s14 = smov 0   ;;  %s490_s15 = smov 0  }
   0x5 LB: > { %s505_s16 = sadd.s32 4294967295, %s460_s15   ;;  %s302_s17 = sadd.s32 4294967294, %s460_s15   ;;  %s460_s15 = sphi %s490_s15, %s672_s15   ;;  %s456_s14 = sphi %s488_s14, %s671_s14   ;;  %s452_s13 = sphi %s486_s13, %s670_s13   ;;  %s448_s12 = sphi %s484_s12, %s669_s12  }
   0x6   : > { %s509_s18 = sadd.s32 1, %s460_s15   ;;  %s26_s19 = sadd.s32 1, %s456_s14 }
   0x7   : > { %s23_s20 = ssub.s32 %s460_s15, %s509_s18  ;;  %p33_p0 = scmp.ne.s32.totalorder %s456_s14, %s452_s13 }
   0x8   : > { %p24_p1 = scmp.eq.s32.totalorder %s23_s20, 0  ;;  %p34_p2 = scmp.eq.s32.totalorder %s460_s15, 0 }
   0x9   : > { %p39_p3 = scmp.ne.s32.totalorder %s452_s13, %s448_s12  ;;  %p40_p4 = scmp.eq.s32.totalorder %s505_s16, 0 }
   0xa   : > { %s521_s21 = scalar_select %p24_p1, %s456_s14, %s26_s19  }
   0xb   : > { %p523_p5 = por %p34_p2, %p33_p0  ;;  %p527_p6 = por %p40_p4, %p39_p3 }
   0xc   : > { %p105_p7 = scmp.eq.s32.totalorder %s505_s16, 1  ;;  %p111_p8 = scmp.eq.s32.totalorder %s302_s17, 1 }
   0xd   : > { %p328_p10 = scmp.lt.s32.totalorder %s460_s15, 2  ;;  %s137_s26 = sand.u32 1, %s456_s14  }
   0xe   : > { %p534_p11 = por %p105_p7, %p33_p0  ;;  %p538_p12 = por %p111_p8, %p39_p3 }
   0xf   : > { %s306_s27 = sshll.u32 %s460_s15, 7  ;;  %s305_s28 = sshll.u32 %s137_s26, 3 }
  0x10   : > { %s661_s24 = scalar_select %p534_p11, 1, 0 }
  0x11   : > { %s662_s25 = scalar_select %p538_p12, 1, 0 }
  0x12   : > { %s547_s4 = scalar_lea.hbm %s654_s0, %s306_s27  ;;  %s141_s5 = scalar_lea.vmem [#allocation2], %s305_s28 }
  0x13   : > { %s148_s6 = sshll.u32 %s141_s5, 4  ;;  %p551_p13 = pnand %p328_p10, %p523_p5  ;;  %s555_s6 = int_to_ptr.vmem [resolvable:$true] %s148_s6 }
  0x14   : > { %s138_s8 = scalar_lea.sflag [#allocation3], %s137_s26  ;;  %s364_s9 = scalar_lea.hbm %s547_s4, 128 }
  0x15   : > { %p365_p2 = scmp.ne.s32.totalorder %s547_s4, %s364_s9  ;;  %p366_p3 = pneg %p551_p13 }
  0x16   : > { %s369_s17 = scalar_lea.hbm %s654_s0, 256  ;;  %p370_p5 = scmp.lt.u32.totalorder %s547_s4, %s654_s0 }
  0x17   : > { %p367_p4 = pnand %p366_p3, %p365_p2  ;;  %p371_p8 = scmp.lt.u32.totalorder %s369_s17, %s364_s9 }
  0x18   : > { %p373_p9 = scmp.lt.u32.totalorder %s364_s9, %s547_s4 }
  0x19   : > { %p368_p7 = pneg %p367_p4  ;;  %p372_p10 = por %p371_p8, %p370_p5 }
  0x1b   : > { %p374_p0 = por %p373_p9, %p372_p10 }
  0x1d   : > { %p375_p1 = pnand %p374_p0, %p368_p7 }
  0x1f   : > { %378 = shalt.err (!%p375_p1)
}
  0x20   : > { %s379_s22 = scalar_lea.vmem %s555_s6, 128  ;;  %s462_s26 = smov [#allocation2]  }
  0x21   : > { %p380_p2 = scmp.ne.s32.totalorder %s555_s6, %s379_s22  ;;  %s384_s27 = sshll.u32 %s462_s26, 4  ;;  %s385_s27 = int_to_ptr.vmem [resolvable:$false] %s384_s27 }
  0x22   : > { %s386_s28 = scalar_lea.vmem %s385_s27, 256  ;;  %p387_p11 = scmp.lt.s32.totalorder %s555_s6, %s385_s27 }
  0x23   : > { %p382_p4 = pnand %p380_p2, %p366_p3  ;;  %p388_p5 = scmp.lt.s32.totalorder %s386_s28, %s379_s22 }
  0x25   : > { %p383_p12 = pneg %p382_p4  ;;  %p389_p8 = por %p388_p5, %p387_p11 }
  0x27   : > { %p390_p9 = pnand %p389_p8, %p383_p12 }
  0x29   : > { %393 = shalt.err (!%p390_p9)
}
  0x2a   : > { %323 = dma.hbm_to_vmem [thread:$0]  (!%p551_p13), %s547_s4, 128, %s555_s6, %s138_s8  }
  0x2b   : > { %p664_p0 = scmp.lt.s32.totalorder %s460_s15, 3  ;;  %p665_p1 = scmp.ge.s32.totalorder %s460_s15, 1 }
  0x2d   : > { %p154_p3 = pnand %p665_p1, %p664_p0 }
  0x2e   : > { %s589_s29 = sand.u32 (!%p154_p3), 1, %s452_s13  }
  0x2f   : > { %157 = sbr.rel (%p154_p3) target bundleno = 383 (0x17f), region = 32  ;;  %s308_s30 = sshll.u32 (!%p154_p3), %s589_s29, 3 }
  0x30   : > { %s160_s5 = scalar_lea.sflag (!%p154_p3), [#allocation3], %s589_s29  ;;  %s163_s9 = scalar_lea.vmem (!%p154_p3), [#allocation2], %s308_s30 }
  0x36   : > { %439 = dma.done.wait (%p527_p6), %s160_s5, 128  }
  0x37   : > { %441 = vsyncadd (%p527_p6), %s160_s5, 4294967168  ;;  %vm187_vm0 = vcmask 261120   ;;  %v186_v0 = vld [vmem:[%s163_s9] sm:$0xff]  ;;  %s313_s8 = sshll.u32 %s505_s16, 7  ;;  %s185_s10 = scalar_lea.vmem [#allocation5], %s308_s30 }
  0x38   : > { %v188_v1 = vsel %vm187_vm0, %v186_v0, 0.0  ;;  %v310_v11 = vld [vmem:[%s655_s1] ss:$0 sm:$0xff]  ;;  %s232_s11 = sshll.u32 %s185_s10, 4  ;;  %s609_s20 = scalar_lea.hbm %s657_s3, %s313_s8  ;;  %s611_s11 = int_to_ptr.vmem [resolvable:$true] %s232_s11 }
  0x39   : > { %189 = vadd.xlane.f32.xlu0 %v188_v1  ;;  %v311_v13 = vld [vmem:[%s656_s2] ss:$0 sm:$0xff]  ;;  %s219_s22 = scalar_lea.sflag [#allocation4], %s589_s29  ;;  %s394_s26 = scalar_lea.vmem %s611_s11, 128 }
  0x3a   : > { %p395_p6 = scmp.ne.s32.totalorder %s611_s11, %s394_s26  ;;  %p666_p11 = scmp.ne.s32.totalorder %s661_s24, 0 }
  0x3b   : > { %s463_s16 = smov [#allocation5]  }
  0x3c   : > { %p396_p12 = pnand %p395_p6, %p666_p11  ;;  %s398_s27 = sshll.u32 %s463_s16, 4  ;;  %s399_s27 = int_to_ptr.vmem [resolvable:$false] %s398_s27 }
  0x3d   : > { %s400_s28 = scalar_lea.vmem %s399_s27, 256  ;;  %p401_p7 = scmp.lt.s32.totalorder %s611_s11, %s399_s27 }
  0x3e   : > { %p397_p13 = pneg %p396_p12  ;;  %p402_p10 = scmp.lt.s32.totalorder %s400_s28, %s394_s26 }
  0x40   : > { %p403_p2 = por %p402_p10, %p401_p7 }
  0x42   : > { %p404_p4 = pnand %p403_p2, %p397_p13 }
  0xc6   : > { %v190_v2 = vpop.xlane.xlu0 %189 }
  0xc7   : > { %v191_v3 = vmul.f32 0.03125, %v190_v2 }
  0xc9   : > { %v192_v4 = vsub.f32 %v186_v0, %v191_v3 }
  0xcb   : > { %v193_v5 = vmul.f32 %v192_v4, %v192_v4 }
  0xcd   : > { %v194_v6 = vsel %vm187_vm0, %v193_v5, 0.0 }
  0xce   : > { %195 = vadd.xlane.f32.xlu0 %v194_v6 }
 0x15b   : > { %v196_v7 = vpop.xlane.xlu0 %195 }
 0x15c   : > { %v197_v8 = vmul.f32 0.03125, %v196_v7 }
 0x15e   : > { %v198_v9 = vadd.f32 1e-06, %v197_v8 }
 0x160   : > { %362 = vrsqrt.f32 %v198_v9 }
 0x16a   : > { %v363_v10 = vpop.eup %362 }
 0x16b   : > { %v200_v12 = vmul.f32 %v363_v10, %v192_v4 }
 0x16d   : > { %v208_v14 = vmul.f32 %v310_v11, %v200_v12 }
 0x16f   : > { %v216_v15 = vadd.f32 %v311_v13, %v208_v14 }
 0x171   : > { %217 = vst.msk [vmem:[%s185_s10] sm:$0xff] %vm187_vm0, %v216_v15 }
 0x172   : > { %407 = shalt.err (!%p404_p4)
}
 0x173   : > { %s408_s29 = scalar_lea.hbm %s609_s20, 128  ;;  %s412_s9 = scalar_lea.hbm %s657_s3, 256 }
 0x174   : > { %p409_p5 = scmp.ne.s32.totalorder %s609_s20, %s408_s29  ;;  %p413_p0 = scmp.lt.u32.totalorder %s609_s20, %s657_s3 }
 0x175   : > { %p414_p1 = scmp.lt.u32.totalorder %s412_s9, %s408_s29  ;;  %p416_p6 = scmp.lt.u32.totalorder %s408_s29, %s609_s20 }
 0x176   : > { %p410_p8 = pnand %p409_p5, %p666_p11 }
 0x177   : > { %p415_p3 = por %p414_p1, %p413_p0 }
 0x178   : > { %p411_p9 = pneg %p410_p8 }
 0x179   : > { %p417_p12 = por %p416_p6, %p415_p3 }
 0x17b   : > { %p418_p13 = pnand %p417_p12, %p411_p9 }
 0x17d   : > { %421 = shalt.err (!%p418_p13)
}
 0x17e   : > { %318 = dma.vmem_to_hbm [thread:$0]  (%p666_p11), %s611_s11, 128, %s609_s20, %s219_s22  }
 0x17f PF: > { %s244_s6 = sand.u32 1, %s448_s12   ;;  %p667_p7 = scmp.ne.s32.totalorder %s662_s25, 0 }
 0x180   : > { %p668_p10 = scmp.ge.s32.totalorder %s460_s15, 2  ;;  %s245_s7 = scalar_lea.sflag [#allocation4], %s244_s6 }
 0x182   : > { %p325_p2 = pnand %p668_p10, %p667_p7 }
 0x184   : > { %443 = dma.done.wait (!%p325_p2), %s245_s7, 128  }
 0x185   : > { %445 = vsyncadd (!%p325_p2), %s245_s7, 4294967168  ;;  %p16_p4 = scmp.ge.s32.totalorder %s509_s18, 4   ;;  %s669_s12 = smov %s452_s13 }
 0x186   : > { %s670_s13 = smov %s456_s14  ;;  %s671_s14 = smov %s521_s21 }
 0x187   : > { %s672_s15 = smov %s509_s18  ;;  %18 = sbr.rel (!%p16_p4) target bundleno = 5 (0x5), region = 77 }
 0x18e   :  { %250 = vsyncpa [#allocation3], 1 }
 0x18f   :  { %252 = vsyncpa [#allocation3 + $0x1], 1 }
 0x190   :  { %253 = vsyncpa [#allocation4], 1 }
 0x191   :  { %255 = vsyncpa [#allocation4 + $0x1], 1 }

</bundles_post_ra>
